<compile_context>
chip_gen: v7x
topology: tpu7x:2x2x1
jax: 0.10.0
libtpu: 0.0.40
codegen_flags: <defaults>
</compile_context>

<pallas_src>
import jax
import jax.numpy as jnp
from jax import lax
from jax.experimental import pallas as pl
from jax.experimental.pallas import tpu as pltpu


def _round_up(n, m):
    return ((n + m - 1) // m) * m


def narx_kernel(x_ref, p_ref, params_ref, o_ref):
    # x_ref:      (TILE_B, F)     activations, batch on sublanes (streamed)
    # p_ref:      (1, TILE_B)     prev_output, batch on lanes (streamed)
    # params_ref: (H, F + 4)      packed [W1_x | w1_prev | b1 | W2.T | b2] (resident)
    # o_ref:      (1, TILE_B)     output, batch on lanes (lane-dense)
    F = x_ref.shape[1]
    w1x = params_ref[:, 0:F]              # (H, F)
    w1p = params_ref[:, F:F + 1]          # (H, 1)  weight column for prev_output
    b1 = params_ref[:, F + 1:F + 2]       # (H, 1)
    w2 = params_ref[:, F + 2:F + 3]       # (H, 1)  == W2.T
    b2 = params_ref[0:1, F + 3:F + 4]     # (1, 1)

    # h = W1_x @ x.T -> (H, TILE_B); contraction over the feature axis of both
    # operands (MXU handles the effective RHS transpose).
    h = lax.dot_general(
        w1x, x_ref[...],
        dimension_numbers=(((1,), (1,)), ((), ())),
        preferred_element_type=jnp.float32,
        precision=lax.Precision.HIGHEST,
    )
    # Fused contribution of the concatenated prev_output column (outer product).
    h = h + w1p * p_ref[...]
    # Bias + ReLU at full 128-lane VPU width.
    h = jnp.maximum(h + b1, 0.0)
    # Output layer as elementwise mul + sublane reduce (avoids an N=1 matmul);
    # result is a lane-dense (1, TILE_B) row.
    y = jnp.sum(h * w2, axis=0, keepdims=True) + b2
    o_ref[...] = y.astype(o_ref.dtype)


def _pick_tiling(batch, device_kind):
    """Choose (tile_b, vmem_limit_bytes) from a per-generation VMEM budget."""
    kind = (device_kind or "").lower()
    if "v5" in kind or "v6" in kind:
        vmem_budget = 64 * 1024 * 1024          # 128 MiB physical VMEM
    else:
        vmem_budget = 48 * 1024 * 1024          # v7x: only 64 MiB physical; unknown -> safe

    # Per-row double-buffered VMEM (f32):
    #   x tile lane-padded 7->128:        2 * 128 * 4 = 1024 B
    #   prev / out rows (1->8 sublanes):  2 * (2 * 8 * 4) = 128 B
    #   implicit MXU-operand transpose + (32, tile_b) intermediates headroom: ~896 B
    bytes_per_row = 2048
    reserved = 2 * 1024 * 1024                  # weights + compiler scratch
    tile_cap = (vmem_budget - reserved) // bytes_per_row
    tile_cap = max(128, (tile_cap // 128) * 128)
    tile_cap = min(tile_cap, 65536)

    tile_b = min(tile_cap, _round_up(batch, 128))

    # v7x: keep the grid >= 2 steps so dimension_semantics=("parallel",) can
    # shard the batch across the two TensorCores.
    if "v7" in kind and batch > 2048 and _round_up(batch, 128) <= tile_cap:
        half = _round_up(-(-batch // 2), 128)
        if half >= 1024:
            tile_b = half
    return tile_b, vmem_budget


def narx_forward(x, prev_output, w1, b1, w2, b2, tile_b=None):
    """Pallas-backed NARXModel.forward.

    x:            (B, input_size)        float32
    prev_output:  (B, 1)                 float32
    w1:           (32, input_size + 1)   float32   (PyTorch Linear weight layout)
    b1:           (32,)                  float32
    w2:           (1, 32)                float32
    b2:           (1,)                   float32
    returns:      (B, 1)                 float32
    """
    B, in_size = x.shape
    hidden = w1.shape[0]

    try:
        kind = jax.devices()[0].device_kind
    except Exception:  # pragma: no cover - defensive
        kind = ""
    auto_tile, vmem_budget = _pick_tiling(B, kind)
    if tile_b is None:
        tile_b = auto_tile
    # Force a 128-multiple (lane-dense loads/stores; (8,128) BlockSpec rule).
    tile_b = _round_up(max(128, int(tile_b)), 128)
    tile_b = min(tile_b, _round_up(B, 128))

    Bp = _round_up(B, tile_b)
    if Bp != B:
        pad = Bp - B
        x = jnp.pad(x, ((0, pad), (0, 0)))
        prev_output = jnp.pad(prev_output, ((0, pad), (0, 0)))

    # Glue (cheap / metadata-only reshapes, tiny param concat) stays in JAX.
    p_row = prev_output.reshape(1, Bp)                       # (1, Bp): batch on lanes
    params = jnp.concatenate(
        [w1,                                                 # (H, F) | (H, 1) prev column
         b1.reshape(hidden, 1),                              # (H, 1)
         w2.reshape(hidden, 1),                              # (H, 1) == W2.T
         jnp.broadcast_to(b2.reshape(1, 1), (hidden, 1))],   # (H, 1) b2 replicated
        axis=1).astype(jnp.float32)                          # (H, F + 4)

    grid = (Bp // tile_b,)

    out = pl.pallas_call(
        narx_kernel,
        out_shape=jax.ShapeDtypeStruct((1, Bp), jnp.float32),
        grid_spec=pltpu.PrefetchScalarGridSpec(
            num_scalar_prefetch=0,
            grid=grid,
            in_specs=[
                pl.BlockSpec((tile_b, in_size), lambda i: (i, 0)),      # x (streamed)
                pl.BlockSpec((1, tile_b), lambda i: (0, i)),            # prev (streamed)
                pl.BlockSpec((hidden, in_size + 4), lambda i: (0, 0)),  # params (resident)
            ],
            out_specs=pl.BlockSpec((1, tile_b), lambda i: (0, i)),      # lane-dense out
        ),
        compiler_params=pltpu.CompilerParams(
            dimension_semantics=("parallel",),
            vmem_limit_bytes=vmem_budget,
        ),
    )(x, p_row, params)

    # (1, Bp) -> drop padding -> (B, 1); row order preserved.
    return out[0, :B].reshape(B, 1)


def narx_ref(x, prev_output, w1, b1, w2, b2):
    xc = jnp.concatenate([x, prev_output], axis=1)
    h = jax.nn.relu(jnp.dot(xc, w1.T, precision=lax.Precision.HIGHEST) + b1)
    return jnp.dot(h, w2.T, precision=lax.Precision.HIGHEST) + b2


if __name__ == "__main__":
    key = jax.random.PRNGKey(0)
    input_size = 7      # so input_size + 1 = 8
    hidden = 32

    k_w1, k_b1, k_w2, k_b2 = jax.random.split(key, 4)

    # Deterministic parameter init mimicking nn.Linear's uniform(-1/sqrt(fan_in), +)
    fan1 = input_size + 1
    bound1 = 1.0 / jnp.sqrt(jnp.float32(fan1))
    w1 = jax.random.uniform(k_w1, (hidden, fan1), minval=-bound1, maxval=bound1,
                            dtype=jnp.float32)
    b1 = jax.random.uniform(k_b1, (hidden,), minval=-bound1, maxval=bound1,
                            dtype=jnp.float32)

    fan2 = hidden
    bound2 = 1.0 / jnp.sqrt(jnp.float32(fan2))
    w2 = jax.random.uniform(k_w2, (1, fan2), minval=-bound2, maxval=bound2,
                            dtype=jnp.float32)
    b2 = jax.random.uniform(k_b2, (1,), minval=-bound2, maxval=bound2,
                            dtype=jnp.float32)

    # Small shape matching the spec, plus a ragged batch to exercise padding/tiling.
    for B in (8, 300):
        kx, kp = jax.random.split(jax.random.fold_in(key, B), 2)
        x = jax.random.normal(kx, (B, input_size), dtype=jnp.float32)
        prev_output = jax.random.normal(kp, (B, 1), dtype=jnp.float32)

        out = narx_forward(x, prev_output, w1, b1, w2, b2)
        out = jax.block_until_ready(out)
        ref = narx_ref(x, prev_output, w1, b1, w2, b2)

        assert out.shape == (B, 1), out.shape
        assert jnp.allclose(out, ref, atol=1e-4, rtol=1e-4), (B, out, ref)

    print("KERNEL_OK")
</pallas_src>

<mosaic_0001>
module attributes {stable_mosaic.version = 11 : i64} {
  func.func @narx_kernel(%arg0: i32, %arg1: memref<128x7xf32, #tpu.memory_space<vmem>>, %arg2: memref<1x128xf32, #tpu.memory_space<vmem>>, %arg3: memref<32x11xf32, #tpu.memory_space<vmem>>, %arg4: memref<1x128xf32, #tpu.memory_space<vmem>>) attributes {dimension_semantics = [#tpu.dimension_semantics<parallel>], iteration_bounds = array<i64: 1>, scalar_prefetch = 0 : i64, scratch_operands = 0 : i64, tpu.core_type = #tpu.core_type<tc>, window_params = [{transform_indices = @transform_0, window_bounds = array<i64: 128, 7>}, {transform_indices = @transform_1, window_bounds = array<i64: 1, 128>}, {pipeline_mode = #tpu.pipeline_mode<synchronous>, transform_indices = @transform_2, window_bounds = array<i64: 32, 11>}, {transform_indices = @transform_3, window_bounds = array<i64: 1, 128>}]} {
    %c0 = arith.constant 0 : index
    %c0_0 = arith.constant 0 : index
    %0 = vector.load %arg3[%c0, %c0_0] : memref<32x11xf32, #tpu.memory_space<vmem>>, vector<32x7xf32>
    %c0_1 = arith.constant 0 : index
    %c7 = arith.constant 7 : index
    %1 = vector.load %arg3[%c0_1, %c7] : memref<32x11xf32, #tpu.memory_space<vmem>>, vector<32x1xf32>
    %c0_2 = arith.constant 0 : index
    %c8 = arith.constant 8 : index
    %2 = vector.load %arg3[%c0_2, %c8] : memref<32x11xf32, #tpu.memory_space<vmem>>, vector<32x1xf32>
    %c0_3 = arith.constant 0 : index
    %c9 = arith.constant 9 : index
    %3 = vector.load %arg3[%c0_3, %c9] : memref<32x11xf32, #tpu.memory_space<vmem>>, vector<32x1xf32>
    %c0_4 = arith.constant 0 : index
    %c10 = arith.constant 10 : index
    %4 = vector.load %arg3[%c0_4, %c10] : memref<32x11xf32, #tpu.memory_space<vmem>>, vector<1x1xf32>
    %c0_5 = arith.constant 0 : index
    %c0_6 = arith.constant 0 : index
    %5 = vector.load %arg1[%c0_5, %c0_6] : memref<128x7xf32, #tpu.memory_space<vmem>>, vector<128x7xf32>
    %cst = arith.constant dense<0.000000e+00> : vector<32x128xf32>
    %6 = tpu.matmul %0, %5, %cst {dimension_numbers = #tpu.dot_dimension_numbers<[1], [1], [0], [0], [0, 0, 1, 0], [], []>, precision = #tpu.contract_precision<fp32>} : vector<32x7xf32>, vector<128x7xf32>, vector<32x128xf32> -> vector<32x128xf32>
    %c0_7 = arith.constant 0 : index
    %c0_8 = arith.constant 0 : index
    %7 = vector.load %arg2[%c0_7, %c0_8] : memref<1x128xf32, #tpu.memory_space<vmem>>, vector<1x128xf32>
    %8 = vector.broadcast %1 : vector<32x1xf32> to vector<32x128xf32>
    %9 = vector.broadcast %7 : vector<1x128xf32> to vector<32x128xf32>
    %10 = arith.mulf %8, %9 : vector<32x128xf32>
    %11 = arith.addf %6, %10 : vector<32x128xf32>
    %12 = vector.broadcast %2 : vector<32x1xf32> to vector<32x128xf32>
    %13 = arith.addf %11, %12 : vector<32x128xf32>
    %cst_9 = arith.constant 0.000000e+00 : f32
    %14 = vector.broadcast %cst_9 : f32 to vector<32x128xf32>
    %15 = arith.maximumf %13, %14 : vector<32x128xf32>
    %16 = vector.broadcast %3 : vector<32x1xf32> to vector<32x128xf32>
    %17 = arith.mulf %15, %16 : vector<32x128xf32>
    %cst_10 = arith.constant dense<0.000000e+00> : vector<128xf32>
    %18 = vector.multi_reduction <add>, %17, %cst_10 [0] : vector<32x128xf32> to vector<128xf32>
    %19 = vector.shape_cast %18 : vector<128xf32> to vector<1x128xf32>
    %20 = vector.broadcast %4 : vector<1x1xf32> to vector<1x128xf32>
    %21 = arith.addf %19, %20 : vector<1x128xf32>
    %c0_11 = arith.constant 0 : index
    %c0_12 = arith.constant 0 : index
    %22 = vector.load %arg4[%c0_11, %c0_12] : memref<1x128xf32, #tpu.memory_space<vmem>>, vector<1x128xf32>
    tpu.vector_store %arg4[%c0_11, %c0_12], %21 {strides = array<i32>} : memref<1x128xf32, #tpu.memory_space<vmem>>, vector<1x128xf32>,
    return
  }
  func.func @transform_0(%arg0: i32) -> (i32, i32) {
    %c0_i32 = arith.constant 0 : i32
    %c0_i32_0 = arith.constant 0 : i32
    return %arg0, %c0_i32 : i32, i32
  }
  func.func @transform_1(%arg0: i32) -> (i32, i32) {
    %c0_i32 = arith.constant 0 : i32
    %c0_i32_0 = arith.constant 0 : i32
    return %c0_i32, %arg0 : i32, i32
  }
  func.func @transform_2(%arg0: i32) -> (i32, i32) {
    %c0_i32 = arith.constant 0 : i32
    %c0_i32_0 = arith.constant 0 : i32
    %c0_i32_1 = arith.constant 0 : i32
    return %c0_i32, %c0_i32_0 : i32, i32
  }
  func.func @transform_3(%arg0: i32) -> (i32, i32) {
    %c0_i32 = arith.constant 0 : i32
    %c0_i32_0 = arith.constant 0 : i32
    return %c0_i32, %arg0 : i32, i32
  }
}

</mosaic_0001>

<bundles_post_ra>
// kernel: tpu_custom_call.1
= control target key start
LH: loop header
LB: loop body
LE: loop exit
PB: predicated region body
PF: predicated region fallthrough
CT: control target
= control target key end

     0   :  { %vm67_vm0 = vcmask 56320   ;;  %s1952_s0 = inlined_call_operand.vmem [shape: f32[128,7], index: 0, kind: input, shape index: {}]   ;;  %s1953_s1 = inlined_call_operand.vmem [shape: f32[1,128], index: 1, kind: input, shape index: {}]   ;;  %s1954_s2 = inlined_call_operand.vmem [shape: f32[32,11], index: 2, kind: input, shape index: {}]   ;;  %s1955_s3 = inlined_call_operand.hbm [shape: f32[1,128], index: 3, kind: output, shape index: {}]  }
   0x1   :  { %v20_v0 = vld [vmem:[%s1952_s0] sm:$0xff]  ;;  %v21_v1 = vld [vmem:[%s1952_s0 + $0x8] sm:$0xff]  ;;  %v22_v2 = vld [vmem:[%s1952_s0 + $0x10] sm:$0xff] }
   0x2   :  { %v1604_v3 = vsel %vm67_vm0, %v20_v0, 0  ;;  %v1607_v4 = vsel %vm67_vm0, %v21_v1, 0  ;;  %v23_v5 = vld [vmem:[%s1952_s0 + $0x18] sm:$0xff]  ;;  %v1613_v6 = vsel %vm67_vm0, %v22_v2, 0  ;;  %v24_v11 = vld [vmem:[%s1952_s0 + $0x20] sm:$0xff]  ;;  %v25_v12 = vld [vmem:[%s1952_s0 + $0x28] sm:$0xff] }
   0x3   :  { %v125_v7 = vand.u32 4294901760, %v1604_v3  ;;  %v128_v8 = vand.u32 4294901760, %v1607_v4  ;;  %v1618_v9 = vsel %vm67_vm0, %v23_v5, 0  ;;  %v131_v10 = vand.u32 4294901760, %v1613_v6  ;;  %v1641_v18 = vld [vmem:[%s1954_s2] sm:$0xff] }
   0x4   :  { %v134_v13 = vand.u32 4294901760, %v1618_v9  ;;  %v89_v16 = vsel %vm67_vm0, %v24_v11, 0  ;;  %v92_v17 = vsel %vm67_vm0, %v25_v12, 0 }
   0x5   :  { %v1628_v14 = vpack.c.bf16 %v128_v8, %v125_v7 }
   0x6   :  { %v1630_v15 = vpack.c.bf16 %v134_v13, %v131_v10 }
   0x7   :  { %1318 = vmatprep.subr.bf16.mxu1 %v1628_v14  ;;  %1414 = vmatprep.subr.bf16.mxu0 %v1628_v14 }
   0x8   :  { %1320 = vmatpush3.bf16.xpose.msra.mxu1 %v1628_v14  ;;  %1416 = vmatpush3.bf16.xpose.msra.mxu0 %v1628_v14 }
   0x9   :  { %8 = vsyncpa [#allocation3], 0  ;;  %1322 = vmatprep.subr.bf16.mxu1 %v1630_v15  ;;  %1418 = vmatprep.subr.bf16.mxu0 %v1630_v15  ;;  %v137_v19 = vand.u32 4294901760, %v89_v16  ;;  %v140_v20 = vand.u32 4294901760, %v92_v17  ;;  %v26_v21 = vld [vmem:[%s1952_s0 + $0x30] sm:$0xff]  ;;  %v27_v22 = vld [vmem:[%s1952_s0 + $0x38] sm:$0xff]  ;;  %v1697_v48 = vsub.f32 %v1604_v3, %v125_v7  ;;  %v1700_v49 = vsub.f32 %v1607_v4, %v128_v8 }
   0xa   :  { %v68_v23 = vsel %vm67_vm0, %v1641_v18, 0  ;;  %v95_v26 = vsel %vm67_vm0, %v26_v21, 0  ;;  %v98_v27 = vsel %vm67_vm0, %v27_v22, 0  ;;  %v28_v33 = vld [vmem:[%s1952_s0 + $0x40] sm:$0xff]  ;;  %v29_v34 = vld [vmem:[%s1952_s0 + $0x48] sm:$0xff]  ;;  %v30_v41 = vld [vmem:[%s1952_s0 + $0x50] sm:$0xff]  ;;  %v1706_v51 = vsub.f32 %v1613_v6, %v131_v10 }
   0xb   :  { %v1653_v24 = vand.u32 4294901760, %v68_v23  ;;  %v1655_v25 = vpack.c.bf16 %v140_v20, %v137_v19  ;;  %v143_v30 = vand.u32 4294901760, %v95_v26  ;;  %v146_v31 = vand.u32 4294901760, %v98_v27  ;;  %v31_v42 = vld [vmem:[%s1952_s0 + $0x58] sm:$0xff]  ;;  %v32_v50 = vld [vmem:[%s1952_s0 + $0x60] sm:$0xff]  ;;  %v33_v55 = vld [vmem:[%s1952_s0 + $0x68] sm:$0xff] }
   0xc   :  { %v101_v37 = vsel %vm67_vm0, %v28_v33, 0  ;;  %v104_v38 = vsel %vm67_vm0, %v29_v34, 0  ;;  %v107_v44 = vsel %vm67_vm0, %v30_v41, 0  ;;  %v110_v45 = vsel %vm67_vm0, %v31_v42, 0  ;;  %v35_v10 = vld [vmem:[%s1952_s0 + $0x78] sm:$0xff]  ;;  %v1773_v12 = vld [vmem:[%s1954_s2 + $0x8] sm:$0xff] }
   0xd   :  { %v1660_v28 = vsub.f32 %v68_v23, %v1653_v24  ;;  %v1674_v36 = vpack.c.bf16 %v146_v31, %v143_v30  ;;  %v149_v39 = vand.u32 4294901760, %v101_v37  ;;  %v152_v40 = vand.u32 4294901760, %v104_v38  ;;  %v1788_v21 = vld [vmem:[%s1954_s2 + $0x10] sm:$0xff] }
   0xe   :  { %v155_v46 = vand.u32 4294901760, %v107_v44  ;;  %v158_v47 = vand.u32 4294901760, %v110_v45  ;;  %v1709_v52 = vsub.f32 %v1618_v9, %v134_v13  ;;  %v1711_v53 = vsub.f32 %v89_v16, %v137_v19  ;;  %v34_v9 = vld [vmem:[%s1952_s0 + $0x70] sm:$0xff] }
   0xf   :  { %v207_v29 = vand.u32 4294901760, %v1660_v28  ;;  %v1688_v43 = vpack.c.bf16 %v152_v40, %v149_v39  ;;  %v1713_v54 = vsub.f32 %v92_v17, %v140_v20  ;;  %v1718_v56 = vsub.f32 %v95_v26, %v143_v30  ;;  %v1801_v30 = vld [vmem:[%s1954_s2 + $0x18] sm:$0xff] }
  0x10   :  { %1324 = vmatpush3.bf16.xpose.msra.mxu1 %v1630_v15  ;;  %1420 = vmatpush3.bf16.xpose.msra.mxu0 %v1630_v15  ;;  %v1720_v57 = vsub.f32 %v98_v27, %v146_v31  ;;  %v1724_v58 = vpack.c.bf16 %v1700_v49, %v1697_v48  ;;  %v1726_v59 = vsub.f32 %v101_v37, %v149_v39  ;;  %v113_v0 = vsel %vm67_vm0, %v32_v50, 0 }
  0x11   :  { %1326 = vmatprep.subr.bf16.mxu1 %v1655_v25  ;;  %1422 = vmatprep.subr.bf16.mxu0 %v1655_v25  ;;  %v208_v32 = vsub.f32 %v1660_v28, %v207_v29  ;;  %v1728_v60 = vsub.f32 %v104_v38, %v152_v40  ;;  %v1732_v61 = vpack.c.bf16 %v1709_v52, %v1706_v51  ;;  %v116_v2 = vsel %vm67_vm0, %v33_v55, 0 }
  0x12   :  { %1235 = vmatprep.mubr.f32.mxu0 %v207_v29  ;;  %v1736_v62 = vpack.c.bf16 %v1713_v54, %v1711_v53  ;;  %v1738_v63 = vpack.c.bf16 %v158_v47, %v155_v46  ;;  %v1743_v1 = vpack.c.bf16 %v1720_v57, %v1718_v56  ;;  %v1746_v3 = vsub.f32 %v107_v44, %v155_v46 }
  0x13   :  { %v209_v35 = vand.u32 4294901760, %v208_v32  ;;  %v1748_v4 = vsub.f32 %v110_v45, %v158_v47  ;;  %v1752_v5 = vpack.c.bf16 %v1728_v60, %v1726_v59  ;;  %v161_v7 = vand.u32 4294901760, %v113_v0 }
  0x14   :  { %v164_v8 = vand.u32 4294901760, %v116_v2  ;;  %v119_v13 = vsel %vm67_vm0, %v34_v9, 0  ;;  %v122_v16 = vsel %vm67_vm0, %v35_v10, 0  ;;  %v70_v20 = vsel %vm67_vm0, %v1773_v12, 0 }
  0x15   :  { %1121 = vmatprep.mubr.f32.mxu1 %v209_v35  ;;  %v1758_v6 = vpack.c.bf16 %v1748_v4, %v1746_v3  ;;  %v1777_v17 = vsub.f32 %v113_v0, %v161_v7  ;;  %v167_v23 = vand.u32 4294901760, %v119_v13  ;;  %v170_v26 = vand.u32 4294901760, %v122_v16 }
  0x16   :  { %v1768_v11 = vpack.c.bf16 %v164_v8, %v161_v7  ;;  %v1779_v19 = vsub.f32 %v116_v2, %v164_v8  ;;  %v248_v27 = vand.u32 4294901760, %v1697_v48  ;;  %v255_v29 = vand.u32 4294901760, %v1700_v49 }
  0x17   :  { %v1803_v31 = vand.u32 4294901760, %v70_v20  ;;  %v72_v32 = vsel %vm67_vm0, %v1788_v21, 0  ;;  %v74_v33 = vsel %vm67_vm0, %v1801_v30, 0  ;;  %v1809_v34 = vpack.c.bf16 %v170_v26, %v167_v23 }
  0x18   :  { %1328 = vmatpush3.bf16.xpose.msra.mxu1 %v1655_v25  ;;  %1424 = vmatpush3.bf16.xpose.msra.mxu0 %v1655_v25  ;;  %v1792_v22 = vpack.c.bf16 %v1779_v19, %v1777_v17  ;;  %v249_v35 = vsub.f32 %v1697_v48, %v248_v27  ;;  %v256_v37 = vsub.f32 %v1700_v49, %v255_v29  ;;  %v1817_v40 = vand.u32 4294901760, %v72_v32 }
  0x19   :  { %1330 = vmatprep.subr.bf16.mxu1 %v1674_v36  ;;  %1426 = vmatprep.subr.bf16.mxu0 %v1674_v36  ;;  %v1813_v38 = vsub.f32 %v119_v13, %v167_v23  ;;  %v1815_v39 = vsub.f32 %v122_v16, %v170_v26  ;;  %v1820_v41 = vsub.f32 %v70_v20, %v1803_v31  ;;  %v1822_v42 = vand.u32 4294901760, %v74_v33 }
  0x1a   :  { %v250_v45 = vand.u32 4294901760, %v249_v35  ;;  %v257_v46 = vand.u32 4294901760, %v256_v37  ;;  %v262_v47 = vand.u32 4294901760, %v1706_v51  ;;  %v269_v48 = vand.u32 4294901760, %v1709_v52 }
  0x1b   :  { %v1828_v44 = vpack.c.bf16 %v1815_v39, %v1813_v38  ;;  %v1835_v49 = vsub.f32 %v72_v32, %v1817_v40  ;;  %v217_v50 = vand.u32 4294901760, %v1820_v41  ;;  %v1839_v55 = vsub.f32 %v74_v33, %v1822_v42 }
  0x1c   :  { %v1349_v0 = vpack.c.bf16 %v257_v46, %v250_v45  ;;  %v1445_v2 = vpack.c.bf16 %v255_v29, %v248_v27  ;;  %v263_v7 = vsub.f32 %v1706_v51, %v262_v47  ;;  %v270_v8 = vsub.f32 %v1709_v52, %v269_v48 }
  0x1d   :  { %v227_v9 = vand.u32 4294901760, %v1835_v49  ;;  %v218_v10 = vsub.f32 %v1820_v41, %v217_v50  ;;  %v237_v13 = vand.u32 4294901760, %v1839_v55  ;;  %v276_v23 = vand.u32 4294901760, %v1711_v53 }
  0x1e   :  { %v264_v16 = vand.u32 4294901760, %v263_v7  ;;  %v271_v20 = vand.u32 4294901760, %v270_v8  ;;  %v283_v51 = vand.u32 4294901760, %v1713_v54  ;;  %v1449_v32 = vpack.c.bf16 %v269_v48, %v262_v47 }
  0x1f   :  { %v228_v52 = vsub.f32 %v1835_v49, %v227_v9  ;;  %v219_v26 = vand.u32 4294901760, %v218_v10  ;;  %v238_v27 = vsub.f32 %v1839_v55, %v237_v13  ;;  %v277_v33 = vsub.f32 %v1711_v53, %v276_v23 }
  0x20   :  { %1332 = vmatpush3.bf16.xpose.msra.mxu1 %v1674_v36  ;;  %1428 = vmatpush3.bf16.xpose.msra.mxu0 %v1674_v36  ;;  %v1353_v29 = vpack.c.bf16 %v271_v20, %v264_v16  ;;  %v284_v35 = vsub.f32 %v1713_v54, %v283_v51  ;;  %v290_v8 = vand.u32 4294901760, %v1718_v56  ;;  %v297_v10 = vand.u32 4294901760, %v1720_v57 }
  0x21   :  { %1334 = vmatprep.subr.bf16.mxu1 %v1688_v43  ;;  %1430 = vmatprep.subr.bf16.mxu0 %v1688_v43  ;;  %v229_v37 = vand.u32 4294901760, %v228_v52  ;;  %v239_v45 = vand.u32 4294901760, %v238_v27  ;;  %v278_v46 = vand.u32 4294901760, %v277_v33  ;;  %v1453_v53 = vpack.c.bf16 %v283_v51, %v276_v23 }
  0x22   :  { %v285_v7 = vand.u32 4294901760, %v284_v35  ;;  %v291_v47 = vsub.f32 %v1718_v56, %v290_v8  ;;  %v298_v48 = vsub.f32 %v1720_v57, %v297_v10  ;;  %v1457_v57 = vpack.c.bf16 %v297_v10, %v290_v8 }
  0x23   :  { %v1570_v23 = vmov 8   ;;  %v325_v27 = vand.u32 4294901760, %v1748_v4  ;;  %v1571_v33 = vmov 9  }
  0x24   :  { %v1357_v54 = vpack.c.bf16 %v285_v7, %v278_v46  ;;  %v339_v46 = vand.u32 4294901760, %v1779_v19 }
  0x26   :  { %v340_v10 = vsub.f32 %v1779_v19, %v339_v46 }
  0x28   :  { %1336 = vmatpush3.bf16.xpose.msra.mxu1 %v1688_v43  ;;  %1432 = vmatpush3.bf16.xpose.msra.mxu0 %v1688_v43 }
  0x29   :  { %1338 = vmatprep.subr.bf16.mxu1 %v1738_v63  ;;  %1434 = vmatprep.subr.bf16.mxu0 %v1738_v63 }
  0x30   :  { %1340 = vmatpush3.bf16.xpose.msra.mxu1 %v1738_v63  ;;  %1436 = vmatpush3.bf16.xpose.msra.mxu0 %v1738_v63 }
  0x31   :  { %1342 = vmatprep.subr.bf16.mxu1 %v1768_v11  ;;  %1438 = vmatprep.subr.bf16.mxu0 %v1768_v11 }
  0x38   :  { %1344 = vmatpush3.bf16.xpose.msra.mxu1 %v1768_v11  ;;  %1440 = vmatpush3.bf16.xpose.msra.mxu0 %v1768_v11 }
  0x39   :  { %1346 = vmatprep.subr.bf16.mxu1 %v1809_v34  ;;  %1442 = vmatprep.subr.bf16.mxu0 %v1809_v34 }
  0x40   :  { %1348 = vmatpush3.bf16.xpose.msra.mxu1 %v1809_v34  ;;  %1444 = vmatpush3.bf16.xpose.msra.mxu0 %v1809_v34 }
  0x41   :  { %1350 = vmatprep.subr.bf16.mxu1 %v1349_v0  ;;  %1446 = vmatprep.subr.bf16.mxu0 %v1445_v2 }
  0x47   :  { %1122 = vmatmul.mubr.f32.vlgmr.msra.gmra.mrb[0].mxu1 %v219_v26  ;;  %1236 = vmatmul.mubr.f32.vlgmr.msra.gmra.mrb[0].mxu0 %v217_v50  ;;  %v1569_v50 = vmov 7   ;;  %v318_v26 = vand.u32 4294901760, %v1746_v3 }
  0x48   :  { %1352 = vmatpush3.bf16.xpose.msra.mxu1 %v1349_v0  ;;  %1448 = vmatpush3.bf16.xpose.msra.mxu0 %v1445_v2  ;;  %v292_v0 = vand.u32 4294901760, %v291_v47  ;;  %v299_v2 = vand.u32 4294901760, %v298_v48  ;;  %v353_v47 = vand.u32 4294901760, %v1815_v39 }
  0x49   :  { %1354 = vmatprep.subr.bf16.mxu1 %v1353_v29  ;;  %1450 = vmatprep.subr.bf16.mxu0 %v1449_v32  ;;  %v1465_v7 = vpack.c.bf16 %v325_v27, %v318_v26 }
  0x4a   :  { %1124 = vmatprep.mubr.f32.mxu1 %v229_v37  ;;  %1238 = vmatprep.mubr.f32.mxu0 %v227_v9  ;;  %v304_v9 = vand.u32 4294901760, %v1726_v59  ;;  %v1361_v56 = vpack.c.bf16 %v299_v2, %v292_v0 }
  0x4b   :  { %1125 = vmatmul.mubr.f32.gmra.mrb[2].mxu1 %v239_v45  ;;  %1239 = vmatmul.mubr.f32.gmra.mrb[2].mxu0 %v237_v13  ;;  %v311_v13 = vand.u32 4294901760, %v1728_v60  ;;  %v332_v45 = vand.u32 4294901760, %v1777_v17 }
  0x4c   :  { %1159 = vmatprep.mubr.f32.mxu1 %v1653_v24  ;;  %1273 = vmatprep.mubr.f32.mxu0 %v1653_v24  ;;  %v305_v16 = vsub.f32 %v1726_v59, %v304_v9 }
  0x4d   :  { %1539 = vset.pattern.permute.xlu1 %v1569_v50  ;;  %1538 = vset.pattern.permute.xlu0 %v1569_v50  ;;  %v312_v20 = vsub.f32 %v1728_v60, %v311_v13  ;;  %v1461_v60 = vpack.c.bf16 %v311_v13, %v304_v9  ;;  %v333_v8 = vsub.f32 %v1777_v17, %v332_v45 }
  0x4e   :  { %49 = vperm.xlu1 %1539, %v1788_v21   ;;  %39 = vperm.xlu0 %1538, %v1641_v18   ;;  %v306_v51 = vand.u32 4294901760, %v305_v16  ;;  %v1469_v48 = vpack.c.bf16 %v339_v46, %v332_v45 }
  0x4f   :  { %v313_v52 = vand.u32 4294901760, %v312_v20 }
  0x50   :  { %1356 = vmatpush3.bf16.xpose.msra.mxu1 %v1353_v29  ;;  %1452 = vmatpush3.bf16.xpose.msra.mxu0 %v1449_v32  ;;  %v319_v29 = vsub.f32 %v1746_v3, %v318_v26  ;;  %v326_v32 = vsub.f32 %v1748_v4, %v325_v27  ;;  %v19_v3 = vld [vmem:[%s1954_s2] sm:$0x1] }
  0x51   :  { %1358 = vmatprep.subr.bf16.mxu1 %v1357_v54  ;;  %1454 = vmatprep.subr.bf16.mxu0 %v1453_v53  ;;  %v1365_v59 = vpack.c.bf16 %v313_v52, %v306_v51 }
  0x52   :  { %54 = vperm.xlu1 %1539, %v1801_v30   ;;  %44 = vperm.xlu0 %1538, %v1773_v12   ;;  %v320_v35 = vand.u32 4294901760, %v319_v29  ;;  %v327_v37 = vand.u32 4294901760, %v326_v32 }
  0x54   :  { %v1369_v4 = vpack.c.bf16 %v327_v37, %v320_v35 }
  0x56   :  { %1541 = vset.pattern.permute.xlu1 %v1570_v23  ;;  %1540 = vset.pattern.permute.xlu0 %v1570_v23 }
  0x57   :  { %899 = vperm.xlu1 %1541, %v1773_v12   ;;  %895 = vperm.xlu0 %1540, %v1641_v18  }
  0x58   :  { %1360 = vmatpush3.bf16.xpose.msra.mxu1 %v1357_v54  ;;  %1456 = vmatpush3.bf16.xpose.msra.mxu0 %v1453_v53  ;;  %v1572_v53 = vmov 10   ;;  %v346_v54 = vand.u32 4294901760, %v1813_v38 }
  0x59   :  { %1362 = vmatprep.subr.bf16.mxu1 %v1361_v56  ;;  %1458 = vmatprep.subr.bf16.mxu0 %v1457_v57 }
  0x5a   :  { %v347_v19 = vsub.f32 %v1813_v38, %v346_v54  ;;  %v1473_v9 = vpack.c.bf16 %v353_v47, %v346_v54 }
  0x5b   :  { %903 = vperm.xlu1 %1541, %v1788_v21   ;;  %907 = vperm.xlu0 %1540, %v1801_v30  }
  0x5c   :  { %v348_v50 = vand.u32 4294901760, %v347_v19 }
  0x5f   :  { %1542 = vset.pattern.permute.xlu1 %v1571_v33  ;;  %1543 = vset.pattern.permute.xlu0 %v1571_v33 }
  0x60   :  { %1364 = vmatpush3.bf16.xpose.msra.mxu1 %v1361_v56  ;;  %1460 = vmatpush3.bf16.xpose.msra.mxu0 %v1457_v57 }
  0x61   :  { %1366 = vmatprep.subr.bf16.mxu1 %v1365_v59  ;;  %1462 = vmatprep.subr.bf16.mxu0 %v1461_v60 }
  0x62   :  { %919 = vperm.xlu1 %1542, %v1641_v18   ;;  %923 = vperm.xlu0 %1543, %v1773_v12   ;;  %v334_v18 = vand.u32 4294901760, %v333_v8  ;;  %v341_v12 = vand.u32 4294901760, %v340_v10 }
  0x64   :  { %v1373_v17 = vpack.c.bf16 %v341_v12, %v334_v18 }
  0x66   :  { %927 = vperm.xlu1 %1542, %v1788_v21   ;;  %1544 = vset.pattern.permute.xlu0 %v1572_v53  ;;  %v354_v21 = vsub.f32 %v1815_v39, %v353_v47 }
  0x67   :  { %949 = vperm.xlu0 %1544, %v19_v3  }
  0x68   :  { %1368 = vmatpush3.bf16.xpose.msra.mxu1 %v1365_v59  ;;  %1464 = vmatpush3.bf16.xpose.msra.mxu0 %v1461_v60  ;;  %v355_v0 = vand.u32 4294901760, %v354_v21 }
  0x69   :  { %1370 = vmatprep.subr.bf16.mxu1 %v1369_v4  ;;  %1466 = vmatprep.subr.bf16.mxu0 %v1465_v7 }
  0x6a   :  { %931 = vperm.xlu1 %1542, %v1801_v30   ;;  %v1377_v2 = vpack.c.bf16 %v355_v0, %v348_v50 }
  0x70   :  { %1372 = vmatpush3.bf16.xpose.msra.mxu1 %v1369_v4  ;;  %1468 = vmatpush3.bf16.xpose.msra.mxu0 %v1465_v7 }
  0x71   :  { %1374 = vmatprep.subr.bf16.mxu1 %v1373_v17  ;;  %1470 = vmatprep.subr.bf16.mxu0 %v1469_v48 }
  0x78   :  { %1376 = vmatpush3.bf16.xpose.msra.mxu1 %v1373_v17  ;;  %1472 = vmatpush3.bf16.xpose.msra.mxu0 %v1469_v48 }
  0x79   :  { %1378 = vmatprep.subr.bf16.mxu1 %v1377_v2  ;;  %1474 = vmatprep.subr.bf16.mxu0 %v1473_v9 }
  0x80   :  { %1380 = vmatpush3.bf16.xpose.msra.mxu1 %v1377_v2  ;;  %1476 = vmatpush3.bf16.xpose.msra.mxu0 %v1473_v9 }
  0x81   :  { %1382 = vmatprep.subr.bf16.mxu1 %v1724_v58  ;;  %1478 = vmatprep.subr.bf16.mxu0 %v1628_v14 }
  0x87   :  { %1160 = vmatmul.mubr.f32.vlgmr.msra.gmra.mrb[0].mxu1 %v1803_v31  ;;  %1274 = vmatmul.mubr.f32.vlgmr.msra.gmra.mrb[0].mxu0 %v1803_v31 }
  0x88   :  { %1384 = vmatpush3.bf16.xpose.msra.mxu1 %v1724_v58  ;;  %1480 = vmatpush3.bf16.xpose.msra.mxu0 %v1628_v14  ;;  %v968_v58 = vld [vmem:[%s1953_s1] ss:$0 sm:$0xff]  ;;  %s1573_s1 = smov [#allocation2]  }
  0x89   :  { %1386 = vmatprep.subr.bf16.mxu1 %v1732_v61  ;;  %1482 = vmatprep.subr.bf16.mxu0 %v1630_v15  ;;  %s960_s27 = sshll.u32 %s1573_s1, 4  ;;  %s961_s27 = int_to_ptr.vmem [resolvable:$true] %s960_s27 }
  0x8a   :  { %1162 = vmatprep.mubr.f32.mxu1 %v1817_v40  ;;  %1276 = vmatprep.mubr.f32.mxu0 %v1817_v40  ;;  %s1545_s28 = scalar_lea.vmem %s961_s27, 16  ;;  %s1549_s29 = scalar_lea.vmem %s961_s27, 32 }
  0x8b   :  { %1163 = vmatmul.mubr.f32.gmra.mrb[2].mxu1 %v1822_v42  ;;  %1277 = vmatmul.mubr.f32.gmra.mrb[2].mxu0 %v1822_v42  ;;  %p1546_p0 = scmp.ne.s32.totalorder %s961_s27, %s1545_s28  ;;  %p1550_p1 = scmp.lt.s32.totalorder %s961_s27, %s961_s27 }
  0x8c   :  { %1197 = vmatprep.mubr.f32.mxu1 %v1660_v28  ;;  %1311 = vmatprep.mubr.f32.mxu0 %v1653_v24  ;;  %p1551_p2 = scmp.lt.s32.totalorder %s1549_s29, %s1545_s28 }
  0x8e   :  { %p1552_p3 = por %p1551_p2, %p1550_p1 }
  0x90   :  { %1388 = vmatpush3.bf16.xpose.msra.mxu1 %v1732_v61  ;;  %1484 = vmatpush3.bf16.xpose.msra.mxu0 %v1630_v15  ;;  %p1553_p4 = pnand %p1552_p3, %p1546_p0 }
  0x91   :  { %1390 = vmatprep.subr.bf16.mxu1 %v1736_v62  ;;  %1486 = vmatprep.subr.bf16.mxu0 %v1655_v25 }
  0x98   :  { %1392 = vmatpush3.bf16.xpose.msra.mxu1 %v1736_v62  ;;  %1488 = vmatpush3.bf16.xpose.msra.mxu0 %v1655_v25 }
  0x99   :  { %1394 = vmatprep.subr.bf16.mxu1 %v1743_v1  ;;  %1490 = vmatprep.subr.bf16.mxu0 %v1674_v36 }
  0xa0   :  { %1396 = vmatpush3.bf16.xpose.msra.mxu1 %v1743_v1  ;;  %1492 = vmatpush3.bf16.xpose.msra.mxu0 %v1674_v36 }
  0xa1   :  { %1398 = vmatprep.subr.bf16.mxu1 %v1752_v5  ;;  %1494 = vmatprep.subr.bf16.mxu0 %v1688_v43 }
  0xa8   :  { %1400 = vmatpush3.bf16.xpose.msra.mxu1 %v1752_v5  ;;  %1496 = vmatpush3.bf16.xpose.msra.mxu0 %v1688_v43 }
  0xa9   :  { %1402 = vmatprep.subr.bf16.mxu1 %v1758_v6  ;;  %1498 = vmatprep.subr.bf16.mxu0 %v1738_v63 }
  0xb0   :  { %1404 = vmatpush3.bf16.xpose.msra.mxu1 %v1758_v6  ;;  %1500 = vmatpush3.bf16.xpose.msra.mxu0 %v1738_v63 }
  0xb1   :  { %1406 = vmatprep.subr.bf16.mxu1 %v1792_v22  ;;  %1502 = vmatprep.subr.bf16.mxu0 %v1768_v11 }
  0xb8   :  { %1408 = vmatpush3.bf16.xpose.msra.mxu1 %v1792_v22  ;;  %1504 = vmatpush3.bf16.xpose.msra.mxu0 %v1768_v11 }
  0xb9   :  { %1410 = vmatprep.subr.bf16.mxu1 %v1828_v44  ;;  %1506 = vmatprep.subr.bf16.mxu0 %v1809_v34 }
  0xc0   :  { %1412 = vmatpush3.bf16.xpose.msra.mxu1 %v1828_v44  ;;  %1508 = vmatpush3.bf16.xpose.msra.mxu0 %v1809_v34 }
  0xc7   :  { %1198 = vmatmul.mubr.f32.vlgmr.msra.gmra.mrb[0].mxu1 %v1820_v41  ;;  %1312 = vmatmul.mubr.f32.vlgmr.msra.gmra.mrb[0].mxu0 %v1803_v31 }
  0xc8   :  { %1200 = vmatprep.mubr.f32.mxu1 %v1835_v49  ;;  %1314 = vmatprep.mubr.f32.mxu0 %v1817_v40 }
  0xcb   :  { %1201 = vmatmul.mubr.f32.gmra.mrb[2].mxu1 %v1839_v55  ;;  %1315 = vmatmul.mubr.f32.gmra.mrb[2].mxu0 %v1822_v42 }
  0xcd   :  { %v50_v14 = vpop.permute.xlu1 %49  ;;  %v40_v15 = vpop.permute.xlu0 %39 }
  0xce   :  { %v63_v62 = vmul.f32 %v968_v58, %v40_v15  ;;  %v65_v39 = vmul.f32 %v968_v58, %v50_v14 }
  0xd1   :  { %v55_v24 = vpop.permute.xlu1 %54  ;;  %v45_v25 = vpop.permute.xlu0 %44 }
  0xd2   :  { %v64_v61 = vmul.f32 %v968_v58, %v45_v25  ;;  %v66_v31 = vmul.f32 %v968_v58, %v55_v24 }
  0xd6   :  { %v900_v28 = vpop.permute.xlu1 %899  ;;  %v896_v36 = vpop.permute.xlu0 %895 }
  0xda   :  { %v904_v43 = vpop.permute.xlu1 %903  ;;  %v908_v30 = vpop.permute.xlu0 %907 }
  0xe1   :  { %v920_v34 = vpop.permute.xlu1 %919  ;;  %v924_v16 = vpop.permute.xlu0 %923 }
  0xe5   :  { %v928_v26 = vpop.permute.xlu1 %927 }
  0xe6   :  { %v950_v12 = vpop.permute.xlu0 %949 }
  0xe9   :  { %v932_v45 = vpop.permute.xlu1 %931 }
 0x19a   :  { %v1199_v63 = vpop.f32.mrb[0].mxu1  ;;  %v1313_v1 = vpop.f32.mrb[0].mxu0 }
 0x19b   :  { %v1509_v5 = vadd.f32 %v1199_v63, %v64_v61  ;;  %v514_v6 = vpop.f32.mrb[1].mxu1  ;;  %v872_v11 = vpop.f32.mrb[1].mxu0 }
 0x19c   :  { %v1511_v22 = vadd.f32 %v514_v6, %v63_v62 }
 0x19d   :  { %v1510_v38 = vadd.f32 %v1509_v5, %v1313_v1 }
 0x19e   :  { %v1512_v40 = vadd.f32 %v1511_v22, %v872_v11  ;;  %v1202_v41 = vpop.f32.mrb[2].mxu1  ;;  %v1316_v42 = vpop.f32.mrb[2].mxu0 }
 0x19f   :  { %v911_v44 = vadd.f32 %v1510_v38, %v900_v28  ;;  %v1513_v49 = vadd.f32 %v1202_v41, %v66_v31  ;;  %v528_v55 = vpop.f32.mrb[3].mxu1  ;;  %v884_v13 = vpop.f32.mrb[3].mxu0 }
 0x1a0   :  { %v910_v56 = vadd.f32 %v1512_v40, %v896_v36  ;;  %v1515_v57 = vadd.f32 %v528_v55, %v65_v39 }
 0x1a1   :  { %v1514_v20 = vadd.f32 %v1513_v49, %v1316_v42  ;;  %v915_v23 = vmax.f32 %v911_v44, 0.0 }
 0x1a2   :  { %v914_v51 = vmax.f32 %v910_v56, 0.0  ;;  %v1516_v52 = vadd.f32 %v1515_v57, %v884_v13 }
 0x1a3   :  { %v913_v27 = vadd.f32 %v1514_v20, %v908_v30  ;;  %v935_v59 = vmul.f32 %v924_v16, %v915_v23 }
 0x1a4   :  { %v912_v60 = vadd.f32 %v1516_v52, %v904_v43  ;;  %v934_v29 = vmul.f32 %v920_v34, %v914_v51 }
 0x1a5   :  { %v917_v33 = vmax.f32 %v913_v27, 0.0 }
 0x1a6   :  { %v916_v32 = vmax.f32 %v912_v60, 0.0  ;;  %v938_v35 = vadd.f32 %v935_v59, %v934_v29 }
 0x1a7   :  { %v937_v46 = vmul.f32 %v932_v45, %v917_v33 }
 0x1a8   :  { %v936_v37 = vmul.f32 %v928_v26, %v916_v32 }
 0x1aa   :  { %v939_v3 = vadd.f32 %v938_v35, %v936_v37 }
 0x1ac   :  { %v940_v4 = vadd.f32 %v939_v3, %v937_v46 }
 0x1ae   :  { %v941_v7 = vrot.slane %v940_v4, 4 }
 0x1b0   :  { %v942_v8 = vadd.f32 %v941_v7, %v940_v4 }
 0x1b2   :  { %v943_v10 = vrot.slane %v942_v8, 2 }
 0x1b4   :  { %v944_v53 = vadd.f32 %v943_v10, %v942_v8 }
 0x1b6   :  { %v945_v18 = vrot.slane %v944_v53, 1 }
 0x1b8   :  { %v946_v54 = vadd.f32 %v945_v18, %v944_v53 }
 0x1ba   :  { %v952_v47 = vadd.f32 %v950_v12, %v946_v54 }
 0x1bc   :  { %953 = vst [vmem:[#allocation2] sm:$0x1] %v952_v47 }
 0x1bd   :  { %1556 = shalt.err (!%p1553_p4)
}
 0x1be   :  { %s1557_s5 = scalar_lea.hbm %s1955_s3, 16 }
 0x1bf   :  { %p1558_p5 = scmp.ne.s32.totalorder %s1955_s3, %s1557_s5  ;;  %p1561_p6 = scmp.lt.u32.totalorder %s1557_s5, %s1955_s3 }
 0x1c1   :  { %p1563_p7 = pnand %p1561_p6, %p1558_p5 }
 0x1c3   :  { %1566 = shalt.err (!%p1563_p7)
}
 0x1c4   :  { %963 = dma.vmem_to_hbm [thread:$0]  %s961_s27, 16, %s1955_s3, [#allocation3]  }
 0x1c5   :  { %1567 = dma.done.wait [#allocation3], 16  }
 0x1c6   :  { %1568 = vsyncadd [#allocation3], 4294967280 }
 0x1c7   :  { %967 = vsyncpa [#allocation3], 1 }

</bundles_post_ra>
